<compile_context>
chip_gen: v6e
topology: v6e:2x2x1
jax: 0.10.0
libtpu: 0.0.40
codegen_flags: <defaults>
</compile_context>

<pallas_src>
import functools

import jax
import jax.numpy as jnp
from jax.experimental import pallas as pl
from jax.experimental.pallas import tpu as pltpu

H1, H2, H3, H4 = 128, 128, 128, 64
_BATCH_TILE = 256  # row-tile size used once the batch is large


def _round_up(n, m):
    return ((n + m - 1) // m) * m


# ----------------------------------------------------------------------------
# Kernel bodies
# ----------------------------------------------------------------------------
def _mlp_body(x, w1, b1, w2, b2, w3, b3, w4, b4, w5, b5):
    """Fused 5-layer MLP. bf16 MXU inputs, f32 accumulation / bias / ReLU."""
    h = jnp.dot(x.astype(jnp.bfloat16), w1, preferred_element_type=jnp.float32) + b1
    h = jnp.maximum(h, 0.0)
    h = jnp.dot(h.astype(jnp.bfloat16), w2, preferred_element_type=jnp.float32) + b2
    h = jnp.maximum(h, 0.0)
    h = jnp.dot(h.astype(jnp.bfloat16), w3, preferred_element_type=jnp.float32) + b3
    h = jnp.maximum(h, 0.0)
    h = jnp.dot(h.astype(jnp.bfloat16), w4, preferred_element_type=jnp.float32) + b4
    h = jnp.maximum(h, 0.0)
    return jnp.dot(h.astype(jnp.bfloat16), w5, preferred_element_type=jnp.float32) + b5


def _ddqn_q_kernel(x_ref, w1, b1, w2, b2, w3, b3, w4, b4, w5, b5, o_ref):
    """Writes the (lane-dense padded) Q values for one batch tile."""
    q = _mlp_body(x_ref[...], w1[...], b1[...], w2[...], b2[...], w3[...], b3[...],
                  w4[...], b4[...], w5[...], b5[...])
    o_ref[...] = q.astype(o_ref.dtype)


def _ddqn_argmax_kernel(x_ref, w1, b1, w2, b2, w3, b3, w4, b4, w5, b5, a_ref, *,
                        action_size):
    """Fused greedy-action head: masks padded lanes and emits int32 argmax."""
    q = _mlp_body(x_ref[...], w1[...], b1[...], w2[...], b2[...], w3[...], b3[...],
                  w4[...], b4[...], w5[...], b5[...])
    col = jax.lax.broadcasted_iota(jnp.int32, q.shape, 1)
    qm = jnp.where(col < action_size, q, -jnp.inf)
    m = jnp.max(qm, axis=-1, keepdims=True)
    # argmax with first-index tie-breaking, built from max/min reductions only.
    idx = jnp.min(jnp.where(qm == m, col, q.shape[-1]), axis=-1, keepdims=True)
    a_ref[...] = idx.astype(jnp.int32)


# ----------------------------------------------------------------------------
# Parameter preparation (one-time, off the hot path)
# ----------------------------------------------------------------------------
def prepare_padded_params(params, action_size):
    """TPU-friendly parameters: bf16 weights [in, out]; f32 biases as (1, C) rows.

    Only the last layer's output dim is padded (to a lane-dense multiple of 128)."""
    out_pad = _round_up(action_size, 128)

    def bias(b, c):
        b = b.astype(jnp.float32)
        return jnp.pad(b, (0, c - b.shape[0])).reshape(1, c)

    def weight(w, cols=None):
        w = w.astype(jnp.bfloat16)
        if cols is not None and cols != w.shape[1]:
            w = jnp.pad(w, ((0, 0), (0, cols - w.shape[1])))
        return w

    return (
        weight(params["w1"]), bias(params["b1"], H1),
        weight(params["w2"]), bias(params["b2"], H2),
        weight(params["w3"]), bias(params["b3"], H3),
        weight(params["w4"]), bias(params["b4"], H4),
        weight(params["w5"], out_pad), bias(params["b5"], out_pad),
    )


# ----------------------------------------------------------------------------
# pallas_call builder shared by the Q and greedy-action entry points
# ----------------------------------------------------------------------------
def _row_map(i):
    return (i, 0)


def _rep_map(i):
    return (0, 0)


def _ddqn_pallas_call(kernel, x, padded_params, out_cols, out_dtype):
    B, state_size = x.shape
    out_pad = padded_params[-2].shape[1]  # w5: (H4, out_pad)

    if B <= _BATCH_TILE:
        # Single full-array block: no batch padding, no wrapper-side pad op.
        tm, B_pad = B, B
        x_p = x
    else:
        tm = _BATCH_TILE
        B_pad = _round_up(B, tm)
        x_p = jnp.pad(x, ((0, B_pad - B), (0, 0)))
    num_tiles = B_pad // tm

    in_specs = [pl.BlockSpec((tm, state_size), _row_map)]
    for p in padded_params:
        in_specs.append(pl.BlockSpec(p.shape, _rep_map))
    out_spec = pl.BlockSpec((tm, out_cols), _row_map)

    flops = 2 * B_pad * (state_size * H1 + H1 * H2 + H2 * H3 + H3 * H4 + H4 * out_pad)
    bytes_accessed = (int(x_p.size) * x_p.dtype.itemsize
                      + sum(int(p.size) * p.dtype.itemsize for p in padded_params)
                      + B_pad * out_cols * jnp.dtype(out_dtype).itemsize)

    return pl.pallas_call(
        kernel,
        out_shape=jax.ShapeDtypeStruct((B_pad, out_cols), out_dtype),
        grid=(num_tiles,),
        in_specs=in_specs,
        out_specs=out_spec,
        compiler_params=pltpu.CompilerParams(
            dimension_semantics=("parallel",),
        ),
        cost_estimate=pl.CostEstimate(
            flops=flops, transcendentals=0, bytes_accessed=bytes_accessed),
    )(x_p, *padded_params)


# ----------------------------------------------------------------------------
# Public entry points
# ----------------------------------------------------------------------------
@jax.jit
def ddqn_forward_padded(x, padded_params):
    """Hot-path Q forward: returns the lane-dense [B_pad, out_pad] Q slab
    (no post-kernel slice). Real Q values live in [:B, :action_size]."""
    out_pad = padded_params[-1].shape[1]
    return _ddqn_pallas_call(_ddqn_q_kernel, x, padded_params, out_pad, jnp.float32)


@functools.partial(jax.jit, static_argnames=("action_size",))
def ddqn_forward(x, padded_params, action_size):
    """Module-semantics forward: x [B, state_size] -> Q [B, action_size]."""
    out_pad = padded_params[-1].shape[1]
    assert action_size <= out_pad, "action_size disagrees with prepared params"
    out_p = _ddqn_pallas_call(_ddqn_q_kernel, x, padded_params, out_pad, jnp.float32)
    return out_p[:x.shape[0], :action_size]


@functools.partial(jax.jit, static_argnames=("action_size",))
def ddqn_greedy_action(x, padded_params, action_size):
    """Fused greedy action selection: argmax over the real Q columns, in-kernel."""
    out_pad = padded_params[-1].shape[1]
    assert action_size <= out_pad, "action_size disagrees with prepared params"
    kernel = functools.partial(_ddqn_argmax_kernel, action_size=action_size)
    idx = _ddqn_pallas_call(kernel, x, padded_params, 1, jnp.int32)
    return idx[:x.shape[0], 0]


# ----------------------------------------------------------------------------
# Init + reference
# ----------------------------------------------------------------------------
def init_ddqn_params(key, state_size, action_size):
    """PyTorch-Linear-style init (uniform +/- 1/sqrt(fan_in)).

    Weights stored [in_features, out_features] (transposed vs PyTorch)."""
    dims = [(state_size, H1), (H1, H2), (H2, H3), (H3, H4), (H4, action_size)]
    params = {}
    for i, (fan_in, fan_out) in enumerate(dims, start=1):
        key, kw, kb = jax.random.split(key, 3)
        bound = 1.0 / (fan_in ** 0.5)
        params[f"w{i}"] = jax.random.uniform(
            kw, (fan_in, fan_out), jnp.float32, minval=-bound, maxval=bound)
        params[f"b{i}"] = jax.random.uniform(
            kb, (fan_out,), jnp.float32, minval=-bound, maxval=bound)
    return params


def _reference_forward(x, params):
    h = jnp.maximum(x @ params["w1"] + params["b1"], 0.0)
    h = jnp.maximum(h @ params["w2"] + params["b2"], 0.0)
    h = jnp.maximum(h @ params["w3"] + params["b3"], 0.0)
    h = jnp.maximum(h @ params["w4"] + params["b4"], 0.0)
    return h @ params["w5"] + params["b5"]


if __name__ == "__main__":
    # Mancala-ish sizes: 14 pits in the state, 6 legal moves.
    state_size = 14
    action_size = 6
    batch = 4

    key = jax.random.PRNGKey(0)
    key, kx = jax.random.split(key)
    x = jax.random.normal(kx, (batch, state_size), jnp.float32)

    params = init_ddqn_params(key, state_size, action_size)

    # One-time, off the hot path.
    padded_params = prepare_padded_params(params, action_size)
    padded_params = jax.tree_util.tree_map(jax.block_until_ready, padded_params)

    # Small-batch (single full-array block) path.
    out = jax.block_until_ready(ddqn_forward(x, padded_params, action_size))
    ref = _reference_forward(x, params)
    assert out.shape == (batch, action_size), out.shape
    # bf16 MXU inputs -> looser tolerance vs the f32 reference.
    assert jnp.allclose(out, ref, atol=5e-2, rtol=5e-2), "mismatch vs JAX reference"

    # Fused greedy-action head (self-consistent with the kernel's Q output).
    act = jax.block_until_ready(ddqn_greedy_action(x, padded_params, action_size))
    assert act.shape == (batch,), act.shape
    assert jnp.array_equal(act, jnp.argmax(out, axis=-1)), "fused argmax mismatch"

    # Large batch exercises the row-tiled (grid > 1, parallel) path.
    key, kx2 = jax.random.split(key)
    x_big = jax.random.normal(kx2, (600, state_size), jnp.float32)
    out_big = jax.block_until_ready(ddqn_forward(x_big, padded_params, action_size))
    ref_big = _reference_forward(x_big, params)
    assert out_big.shape == (600, action_size)
    assert jnp.allclose(out_big, ref_big, atol=5e-2, rtol=5e-2), "mismatch (tiled path)"

    print("KERNEL_OK")
</pallas_src>

<mosaic_0001>
module attributes {stable_mosaic.version = 11 : i64} {
  func.func @_ddqn_q_kernel(%arg0: i32, %arg1: memref<4x14xf32, #tpu.memory_space<vmem>>, %arg2: memref<14x128xbf16, #tpu.memory_space<vmem>>, %arg3: memref<1x128xf32, #tpu.memory_space<vmem>>, %arg4: memref<128x128xbf16, #tpu.memory_space<vmem>>, %arg5: memref<1x128xf32, #tpu.memory_space<vmem>>, %arg6: memref<128x128xbf16, #tpu.memory_space<vmem>>, %arg7: memref<1x128xf32, #tpu.memory_space<vmem>>, %arg8: memref<128x64xbf16, #tpu.memory_space<vmem>>, %arg9: memref<1x64xf32, #tpu.memory_space<vmem>>, %arg10: memref<64x128xbf16, #tpu.memory_space<vmem>>, %arg11: memref<1x128xf32, #tpu.memory_space<vmem>>, %arg12: memref<4x128xf32, #tpu.memory_space<vmem>>) attributes {dimension_semantics = [#tpu.dimension_semantics<parallel>], iteration_bounds = array<i64: 1>, scalar_prefetch = 0 : i64, scratch_operands = 0 : i64, tpu.core_type = #tpu.core_type<tc>, window_params = [{transform_indices = @transform_0, window_bounds = array<i64: 4, 14>}, {pipeline_mode = #tpu.pipeline_mode<synchronous>, transform_indices = @transform_1, window_bounds = array<i64: 14, 128>}, {pipeline_mode = #tpu.pipeline_mode<synchronous>, transform_indices = @transform_2, window_bounds = array<i64: 1, 128>}, {pipeline_mode = #tpu.pipeline_mode<synchronous>, transform_indices = @transform_3, window_bounds = array<i64: 128, 128>}, {pipeline_mode = #tpu.pipeline_mode<synchronous>, transform_indices = @transform_4, window_bounds = array<i64: 1, 128>}, {pipeline_mode = #tpu.pipeline_mode<synchronous>, transform_indices = @transform_5, window_bounds = array<i64: 128, 128>}, {pipeline_mode = #tpu.pipeline_mode<synchronous>, transform_indices = @transform_6, window_bounds = array<i64: 1, 128>}, {pipeline_mode = #tpu.pipeline_mode<synchronous>, transform_indices = @transform_7, window_bounds = array<i64: 128, 64>}, {pipeline_mode = #tpu.pipeline_mode<synchronous>, transform_indices = @transform_8, window_bounds = array<i64: 1, 64>}, {pipeline_mode = #tpu.pipeline_mode<synchronous>, transform_indices = @transform_9, window_bounds = array<i64: 64, 128>}, {pipeline_mode = #tpu.pipeline_mode<synchronous>, transform_indices = @transform_10, window_bounds = array<i64: 1, 128>}, {transform_indices = @transform_11, window_bounds = array<i64: 4, 128>}]} {
    %c0 = arith.constant 0 : index
    %c0_0 = arith.constant 0 : index
    %0 = vector.load %arg1[%c0, %c0_0] : memref<4x14xf32, #tpu.memory_space<vmem>>, vector<4x14xf32>
    %c0_1 = arith.constant 0 : index
    %c0_2 = arith.constant 0 : index
    %1 = vector.load %arg2[%c0_1, %c0_2] : memref<14x128xbf16, #tpu.memory_space<vmem>>, vector<14x128xbf16>
    %c0_3 = arith.constant 0 : index
    %c0_4 = arith.constant 0 : index
    %2 = vector.load %arg3[%c0_3, %c0_4] : memref<1x128xf32, #tpu.memory_space<vmem>>, vector<1x128xf32>
    %c0_5 = arith.constant 0 : index
    %c0_6 = arith.constant 0 : index
    %3 = vector.load %arg4[%c0_5, %c0_6] : memref<128x128xbf16, #tpu.memory_space<vmem>>, vector<128x128xbf16>
    %c0_7 = arith.constant 0 : index
    %c0_8 = arith.constant 0 : index
    %4 = vector.load %arg5[%c0_7, %c0_8] : memref<1x128xf32, #tpu.memory_space<vmem>>, vector<1x128xf32>
    %c0_9 = arith.constant 0 : index
    %c0_10 = arith.constant 0 : index
    %5 = vector.load %arg6[%c0_9, %c0_10] : memref<128x128xbf16, #tpu.memory_space<vmem>>, vector<128x128xbf16>
    %c0_11 = arith.constant 0 : index
    %c0_12 = arith.constant 0 : index
    %6 = vector.load %arg7[%c0_11, %c0_12] : memref<1x128xf32, #tpu.memory_space<vmem>>, vector<1x128xf32>
    %c0_13 = arith.constant 0 : index
    %c0_14 = arith.constant 0 : index
    %7 = vector.load %arg8[%c0_13, %c0_14] : memref<128x64xbf16, #tpu.memory_space<vmem>>, vector<128x64xbf16>
    %c0_15 = arith.constant 0 : index
    %c0_16 = arith.constant 0 : index
    %8 = vector.load %arg9[%c0_15, %c0_16] : memref<1x64xf32, #tpu.memory_space<vmem>>, vector<1x64xf32>
    %c0_17 = arith.constant 0 : index
    %c0_18 = arith.constant 0 : index
    %9 = vector.load %arg10[%c0_17, %c0_18] : memref<64x128xbf16, #tpu.memory_space<vmem>>, vector<64x128xbf16>
    %c0_19 = arith.constant 0 : index
    %c0_20 = arith.constant 0 : index
    %10 = vector.load %arg11[%c0_19, %c0_20] : memref<1x128xf32, #tpu.memory_space<vmem>>, vector<1x128xf32>
    %11 = arith.truncf %0 : vector<4x14xf32> to vector<4x14xbf16>
    %cst = arith.constant dense<0.000000e+00> : vector<4x128xf32>
    %12 = tpu.matmul %11, %1, %cst {dimension_numbers = #tpu.dot_dimension_numbers<[1], [0], [0], [1], [0, 0, 1, 1], [], []>} : vector<4x14xbf16>, vector<14x128xbf16>, vector<4x128xf32> -> vector<4x128xf32>
    %13 = vector.broadcast %2 : vector<1x128xf32> to vector<4x128xf32>
    %14 = arith.addf %12, %13 : vector<4x128xf32>
    %cst_21 = arith.constant 0.000000e+00 : f32
    %15 = vector.broadcast %cst_21 : f32 to vector<4x128xf32>
    %16 = arith.maximumf %14, %15 : vector<4x128xf32>
    %17 = arith.truncf %16 : vector<4x128xf32> to vector<4x128xbf16>
    %cst_22 = arith.constant dense<0.000000e+00> : vector<4x128xf32>
    %18 = tpu.matmul %17, %3, %cst_22 {dimension_numbers = #tpu.dot_dimension_numbers<[1], [0], [0], [1], [0, 0, 1, 1], [], []>} : vector<4x128xbf16>, vector<128x128xbf16>, vector<4x128xf32> -> vector<4x128xf32>
    %19 = vector.broadcast %4 : vector<1x128xf32> to vector<4x128xf32>
    %20 = arith.addf %18, %19 : vector<4x128xf32>
    %cst_23 = arith.constant 0.000000e+00 : f32
    %21 = vector.broadcast %cst_23 : f32 to vector<4x128xf32>
    %22 = arith.maximumf %20, %21 : vector<4x128xf32>
    %23 = arith.truncf %22 : vector<4x128xf32> to vector<4x128xbf16>
    %cst_24 = arith.constant dense<0.000000e+00> : vector<4x128xf32>
    %24 = tpu.matmul %23, %5, %cst_24 {dimension_numbers = #tpu.dot_dimension_numbers<[1], [0], [0], [1], [0, 0, 1, 1], [], []>} : vector<4x128xbf16>, vector<128x128xbf16>, vector<4x128xf32> -> vector<4x128xf32>
    %25 = vector.broadcast %6 : vector<1x128xf32> to vector<4x128xf32>
    %26 = arith.addf %24, %25 : vector<4x128xf32>
    %cst_25 = arith.constant 0.000000e+00 : f32
    %27 = vector.broadcast %cst_25 : f32 to vector<4x128xf32>
    %28 = arith.maximumf %26, %27 : vector<4x128xf32>
    %29 = arith.truncf %28 : vector<4x128xf32> to vector<4x128xbf16>
    %cst_26 = arith.constant dense<0.000000e+00> : vector<4x64xf32>
    %30 = tpu.matmul %29, %7, %cst_26 {dimension_numbers = #tpu.dot_dimension_numbers<[1], [0], [0], [1], [0, 0, 1, 1], [], []>} : vector<4x128xbf16>, vector<128x64xbf16>, vector<4x64xf32> -> vector<4x64xf32>
    %31 = vector.broadcast %8 : vector<1x64xf32> to vector<4x64xf32>
    %32 = arith.addf %30, %31 : vector<4x64xf32>
    %cst_27 = arith.constant 0.000000e+00 : f32
    %33 = vector.broadcast %cst_27 : f32 to vector<4x64xf32>
    %34 = arith.maximumf %32, %33 : vector<4x64xf32>
    %35 = arith.truncf %34 : vector<4x64xf32> to vector<4x64xbf16>
    %cst_28 = arith.constant dense<0.000000e+00> : vector<4x128xf32>
    %36 = tpu.matmul %35, %9, %cst_28 {dimension_numbers = #tpu.dot_dimension_numbers<[1], [0], [0], [1], [0, 0, 1, 1], [], []>} : vector<4x64xbf16>, vector<64x128xbf16>, vector<4x128xf32> -> vector<4x128xf32>
    %37 = vector.broadcast %10 : vector<1x128xf32> to vector<4x128xf32>
    %38 = arith.addf %36, %37 : vector<4x128xf32>
    %c0_29 = arith.constant 0 : index
    %c0_30 = arith.constant 0 : index
    %39 = vector.load %arg12[%c0_29, %c0_30] : memref<4x128xf32, #tpu.memory_space<vmem>>, vector<4x128xf32>
    tpu.vector_store %arg12[%c0_29, %c0_30], %38 {strides = array<i32>} : memref<4x128xf32, #tpu.memory_space<vmem>>, vector<4x128xf32>,
    return
  }
  func.func @transform_0(%arg0: i32) -> (i32, i32) {
    %c0_i32 = arith.constant 0 : i32
    %c0_i32_0 = arith.constant 0 : i32
    return %arg0, %c0_i32 : i32, i32
  }
  func.func @transform_1(%arg0: i32) -> (i32, i32) {
    %c0_i32 = arith.constant 0 : i32
    %c0_i32_0 = arith.constant 0 : i32
    %c0_i32_1 = arith.constant 0 : i32
    return %c0_i32, %c0_i32_0 : i32, i32
  }
  func.func @transform_2(%arg0: i32) -> (i32, i32) {
    %c0_i32 = arith.constant 0 : i32
    %c0_i32_0 = arith.constant 0 : i32
    %c0_i32_1 = arith.constant 0 : i32
    return %c0_i32, %c0_i32_0 : i32, i32
  }
  func.func @transform_3(%arg0: i32) -> (i32, i32) {
    %c0_i32 = arith.constant 0 : i32
    %c0_i32_0 = arith.constant 0 : i32
    %c0_i32_1 = arith.constant 0 : i32
    return %c0_i32, %c0_i32_0 : i32, i32
  }
  func.func @transform_4(%arg0: i32) -> (i32, i32) {
    %c0_i32 = arith.constant 0 : i32
    %c0_i32_0 = arith.constant 0 : i32
    %c0_i32_1 = arith.constant 0 : i32
    return %c0_i32, %c0_i32_0 : i32, i32
  }
  func.func @transform_5(%arg0: i32) -> (i32, i32) {
    %c0_i32 = arith.constant 0 : i32
    %c0_i32_0 = arith.constant 0 : i32
    %c0_i32_1 = arith.constant 0 : i32
    return %c0_i32, %c0_i32_0 : i32, i32
  }
  func.func @transform_6(%arg0: i32) -> (i32, i32) {
    %c0_i32 = arith.constant 0 : i32
    %c0_i32_0 = arith.constant 0 : i32
    %c0_i32_1 = arith.constant 0 : i32
    return %c0_i32, %c0_i32_0 : i32, i32
  }
  func.func @transform_7(%arg0: i32) -> (i32, i32) {
    %c0_i32 = arith.constant 0 : i32
    %c0_i32_0 = arith.constant 0 : i32
    %c0_i32_1 = arith.constant 0 : i32
    return %c0_i32, %c0_i32_0 : i32, i32
  }
  func.func @transform_8(%arg0: i32) -> (i32, i32) {
    %c0_i32 = arith.constant 0 : i32
    %c0_i32_0 = arith.constant 0 : i32
    %c0_i32_1 = arith.constant 0 : i32
    return %c0_i32, %c0_i32_0 : i32, i32
  }
  func.func @transform_9(%arg0: i32) -> (i32, i32) {
    %c0_i32 = arith.constant 0 : i32
    %c0_i32_0 = arith.constant 0 : i32
    %c0_i32_1 = arith.constant 0 : i32
    return %c0_i32, %c0_i32_0 : i32, i32
  }
  func.func @transform_10(%arg0: i32) -> (i32, i32) {
    %c0_i32 = arith.constant 0 : i32
    %c0_i32_0 = arith.constant 0 : i32
    %c0_i32_1 = arith.constant 0 : i32
    return %c0_i32, %c0_i32_0 : i32, i32
  }
  func.func @transform_11(%arg0: i32) -> (i32, i32) {
    %c0_i32 = arith.constant 0 : i32
    %c0_i32_0 = arith.constant 0 : i32
    return %arg0, %c0_i32 : i32, i32
  }
}

</mosaic_0001>

<bundles_post_ra>
// kernel: ddqn_forward.1
= control target key start
LH: loop header
LB: loop body
LE: loop exit
PB: predicated region body
PF: predicated region fallthrough
CT: control target
= control target key end

     0   :  { %16 = vsyncpa [#allocation3], 0  ;;  %s1016_s0 = inlined_call_operand.vmem [shape: f32[4,14], index: 0, kind: input, shape index: {}]   ;;  %s1017_s1 = inlined_call_operand.hbm [shape: bf16[14,128], index: 1, kind: input, shape index: {}]   ;;  %s1018_s2 = inlined_call_operand.vmem [shape: f32[1,128], index: 2, kind: input, shape index: {}]   ;;  %s1019_s3 = inlined_call_operand.vmem [shape: bf16[128,128], index: 3, kind: input, shape index: {}]   ;;  %s1020_s4 = inlined_call_operand.vmem [shape: f32[1,128], index: 4, kind: input, shape index: {}]   ;;  %s1021_s5 = inlined_call_operand.hbm [shape: bf16[128,128], index: 5, kind: input, shape index: {}]   ;;  %s1022_s6 = inlined_call_operand.vmem [shape: f32[1,128], index: 6, kind: input, shape index: {}]   ;;  %s1023_s7 = inlined_call_operand.vmem [shape: bf16[128,64], index: 7, kind: input, shape index: {}]   ;;  %s1024_s8 = inlined_call_operand.vmem [shape: f32[1,64], index: 8, kind: input, shape index: {}]   ;;  %s1025_s9 = inlined_call_operand.vmem [shape: bf16[64,128], index: 9, kind: input, shape index: {}]   ;;  %s1026_s10 = inlined_call_operand.vmem [shape: f32[1,128], index: 10, kind: input, shape index: {}]   ;;  %s1027_s11 = inlined_call_operand.hbm [shape: f32[4,128], index: 11, kind: output, shape index: {}]  }
   0x1   :  { %17 = vsyncpa [#allocation6], 0 }
   0x2   :  { %18 = vsyncpa [#allocation4], 0  ;;  %s823_s17 = smov [#allocation2]  }
   0x3   :  { %s26_s18 = sshll.u32 %s823_s17, 4  ;;  %s27_s18 = int_to_ptr.vmem [resolvable:$true] %s26_s18 }
   0x4   :  { %s765_s19 = scalar_lea.vmem %s27_s18, 128  ;;  %p770_p1 = scmp.lt.s32.totalorder %s27_s18, %s27_s18 }
   0x5   :  { %p766_p0 = scmp.ne.s32.totalorder %s27_s18, %s765_s19  ;;  %p771_p2 = scmp.lt.s32.totalorder %s765_s19, %s765_s19 }
   0x7   :  { %p772_p3 = por %p771_p2, %p770_p1 }
   0x9   :  { %p773_p4 = pnand %p772_p3, %p766_p0 }
   0xb   :  { %776 = shalt.err (!%p773_p4)
}
   0xc   :  { %s824_s20 = smov 64   ;;  %s825_s21 = smov 4  }
   0xd   :  { %32 = dma.hbm_to_vmem [thread:$0]  %s1017_s1, 128, %s27_s18, [#allocation3], %s824_s20, %s824_s20, %s825_s21  }
   0xe   :  { %s826_s24 = smov [#allocation5]  }
   0xf   :  { %s44_s25 = sshll.u32 %s826_s24, 4  ;;  %s45_s25 = int_to_ptr.vmem [resolvable:$true] %s44_s25 }
  0x10   :  { %s785_s26 = scalar_lea.vmem %s45_s25, 1024  ;;  %p790_p6 = scmp.lt.s32.totalorder %s45_s25, %s45_s25 }
  0x11   :  { %p786_p5 = scmp.ne.s32.totalorder %s45_s25, %s785_s26  ;;  %p791_p7 = scmp.lt.s32.totalorder %s785_s26, %s785_s26 }
  0x13   :  { %p792_p8 = por %p791_p7, %p790_p6 }
  0x15   :  { %p793_p9 = pnand %p792_p8, %p786_p5 }
  0x17   :  { %796 = shalt.err (!%p793_p9)
}
  0x18   :  { %50 = dma.hbm_to_vmem [thread:$0]  %s1021_s5, 1024, %s45_s25, [#allocation6], %s824_s20, %s824_s20, %s825_s21  }
  0x19   :  { %817 = dma.done.wait [#allocation3], 128  }
  0x1a   :  { %818 = vsyncadd [#allocation3], 4294967168 }
  0x1b   :  { %819 = dma.done.wait [#allocation6], 1024  }
  0x1c   :  { %820 = vsyncadd [#allocation6], 4294966272  ;;  %v827_v0 = vmov 0.0   ;;  %vm828_vm0 = vmmov 0   ;;  %vm148_vm1 = vcmask 1046528   ;;  %v729_v5 = vld [vmem:[%s1019_s3 + $0x38] sm:$0xff]  }
  0x1d   :  { %643 = vmatprep.subr.bf16.mxu0 %v827_v0  ;;  %645 = vmatprep.mubr.msk.bf16.mxu0 %vm828_vm0, %v827_v0  ;;  %v728_v1 = vld [vmem:[#allocation2] sm:$0x7f]   ;;  %vm144_vm2 = vcmask 113664   ;;  %v730_v6 = vld [vmem:[%s1019_s3 + $0x30] sm:$0xff]   ;;  %v731_v7 = vld [vmem:[%s1019_s3 + $0x28] sm:$0xff]   ;;  %vm512_vm3 = vcmask 523264  }
  0x1e   :  { %649 = vmatprep.subr.bf16.mxu1 %v827_v0  ;;  %665 = vmatprep.mubr.msk.bf16.mxu1 %vm828_vm0, %v827_v0  ;;  %v68_v2 = vld [vmem:[%s1016_s0] sm:$0xf]  ;;  %v150_v3 = vsel %vm148_vm1, %v728_v1, 0  ;;  %v733_v9 = vld [vmem:[%s1019_s3 + $0x18] sm:$0xff]   ;;  %v734_v10 = vld [vmem:[%s1019_s3 + $0x10] sm:$0xff]   ;;  %s829_s5 = smov [#allocation7]  }
  0x1f   :  { %v132_v4 = vpack.c.bf16 %v68_v2, %v68_v2  ;;  %644 = vmatpush3.bf16.msra.mxu0 %v150_v3  ;;  %650 = vmatpush3.bf16.msra.mxu1 %v729_v5  ;;  %v732_v8 = vld [vmem:[%s1019_s3 + $0x20] sm:$0xff]   ;;  %v735_v11 = vld [vmem:[%s1019_s3 + $0x8] sm:$0xff]   ;;  %v738_v14 = vld [vmem:[#allocation5 + $0x30] sm:$0xff]  }
  0x20   :  { %669 = vmatprep.subr.bf16.mxu0 %v827_v0  ;;  %651 = vmatprep.subr.bf16.mxu1 %v827_v0  ;;  %v736_v12 = vld [vmem:[%s1019_s3] sm:$0xff]   ;;  %v739_v15 = vld [vmem:[#allocation5 + $0x28] sm:$0xff]   ;;  %v740_v16 = vld [vmem:[#allocation5 + $0x20] sm:$0xff]  }
  0x21   :  { %v737_v13 = vld [vmem:[#allocation5 + $0x38] sm:$0xff]   ;;  %v742_v18 = vld [vmem:[#allocation5 + $0x10] sm:$0xff]   ;;  %v743_v27 = vld [vmem:[#allocation5 + $0x8] sm:$0xff]  }
  0x22   :  { %646 = vmatmul.mubr.msk.bf16.vlgmr.msra.gmra.mxu0 %vm144_vm2, %v132_v4  ;;  %v741_v17 = vld [vmem:[#allocation5 + $0x18] sm:$0xff]   ;;  %v744_v28 = vld [vmem:[#allocation5] sm:$0xff]   ;;  %v745_v29 = vld [vmem:[%s1023_s7 + $0x38] sm:$0xff]  }
  0x23   :  { %685 = vmatprep.mubr.msk.bf16.mxu0 %vm828_vm0, %v827_v0  ;;  %652 = vmatpush3.bf16.msra.mxu1 %v730_v6  ;;  %v573_v19 = vld [vmem:[%s1018_s2] ss:$0 sm:$0xff]  ;;  %v746_v30 = vld [vmem:[%s1023_s7 + $0x30] sm:$0xff]   ;;  %v747_v31 = vld [vmem:[%s1023_s7 + $0x28] sm:$0xff]  }
  0x24   :  { %653 = vmatprep.subr.bf16.mxu1 %v827_v0  ;;  %670 = vmatpush3.bf16.msra.mxu0 %v737_v13  ;;  %v748_v32 = vld [vmem:[%s1023_s7 + $0x20] sm:$0xff]   ;;  %v749_v33 = vld [vmem:[%s1023_s7 + $0x18] sm:$0xff]   ;;  %v750_v34 = vld [vmem:[%s1023_s7 + $0x10] sm:$0xff]  }
  0x25   :  { %671 = vmatprep.subr.bf16.mxu0 %v827_v0  ;;  %v576_v35 = vld [vmem:[%s1020_s4] ss:$0 sm:$0xff]  ;;  %v751_v43 = vld [vmem:[%s1023_s7 + $0x8] sm:$0xff]   ;;  %v753_v45 = vld [vmem:[%s1025_s9 + $0x18] sm:$0xff]  }
  0x26   :  { %v752_v44 = vld [vmem:[%s1023_s7] sm:$0xff]   ;;  %v754_v46 = vld [vmem:[%s1025_s9 + $0x10] sm:$0xff]   ;;  %v755_v55 = vld [vmem:[%s1025_s9 + $0x8] sm:$0xff]  }
  0x27   :  { %654 = vmatpush3.bf16.msra.mxu1 %v731_v7  ;;  %v585_v47 = vld [vmem:[%s1022_s6] ss:$0 sm:$0xff] }
  0x28   :  { %655 = vmatprep.subr.bf16.mxu1 %v827_v0  ;;  %672 = vmatpush3.bf16.msra.mxu0 %v738_v14  ;;  %v756_v56 = vld [vmem:[%s1025_s9] sm:$0xff]   ;;  %s563_s9 = sshll.u32 %s829_s5, 4  ;;  %s564_s9 = int_to_ptr.vmem [resolvable:$true] %s563_s9 }
  0x29   :  { %673 = vmatprep.subr.bf16.mxu0 %v827_v0  ;;  %v594_v57 = vld [vmem:[%s1024_s8] ss:$0 sm:$0xff]  ;;  %s797_s8 = scalar_lea.vmem %s564_s9, 64  ;;  %p802_p11 = scmp.lt.s32.totalorder %s564_s9, %s564_s9 }
  0x2a   :  { %p798_p10 = scmp.ne.s32.totalorder %s564_s9, %s797_s8  ;;  %p803_p12 = scmp.lt.s32.totalorder %s797_s8, %s797_s8 }
  0x2b   :  { %656 = vmatpush3.bf16.msra.mxu1 %v732_v8 }
  0x2c   :  { %657 = vmatprep.subr.bf16.mxu1 %v827_v0  ;;  %674 = vmatpush3.bf16.msra.mxu0 %v739_v15  ;;  %p804_p13 = por %p803_p12, %p802_p11 }
  0x2d   :  { %675 = vmatprep.subr.bf16.mxu0 %v827_v0 }
  0x2e   :  { %p805_p0 = pnand %p804_p13, %p798_p10 }
  0x2f   :  { %658 = vmatpush3.bf16.msra.mxu1 %v733_v9 }
  0x30   :  { %659 = vmatprep.subr.bf16.mxu1 %v827_v0  ;;  %676 = vmatpush3.bf16.msra.mxu0 %v740_v16 }
  0x31   :  { %677 = vmatprep.subr.bf16.mxu0 %v827_v0 }
  0x33   :  { %660 = vmatpush3.bf16.msra.mxu1 %v734_v10 }
  0x34   :  { %661 = vmatprep.subr.bf16.mxu1 %v827_v0  ;;  %678 = vmatpush3.bf16.msra.mxu0 %v741_v17 }
  0x35   :  { %679 = vmatprep.subr.bf16.mxu0 %v827_v0 }
  0x37   :  { %662 = vmatpush3.bf16.msra.mxu1 %v735_v11 }
  0x38   :  { %663 = vmatprep.subr.bf16.mxu1 %v827_v0  ;;  %680 = vmatpush3.bf16.msra.mxu0 %v742_v18 }
  0x39   :  { %681 = vmatprep.subr.bf16.mxu0 %v827_v0 }
  0x3b   :  { %664 = vmatpush3.bf16.msra.mxu1 %v736_v12 }
  0x3c   :  { %689 = vmatprep.subr.bf16.mxu1 %v827_v0  ;;  %682 = vmatpush3.bf16.msra.mxu0 %v743_v27 }
  0x3d   :  { %683 = vmatprep.subr.bf16.mxu0 %v827_v0 }
  0x40   :  { %684 = vmatpush3.bf16.msra.mxu0 %v744_v28 }
  0x41   :  { %709 = vmatprep.subr.bf16.mxu0 %v827_v0 }
  0xe2   :  { %v186_v20 = vpop.f32.mrf.mxu0 }
  0xe3   :  { %v187_v21 = vadd.f32 %v573_v19, %v186_v20 }
  0xe4   :  { %v647_v22 = vpop.f32.mrf.mxu0 }
  0xe5   :  { %v192_v23 = vmax.f32 %v187_v21, 0.0 }
  0xe6   :  { %v189_v24 = vpop.f32.mrf.mxu0 }
  0xe7   :  { %v193_v25 = vpack.c.bf16 %v192_v23, %v192_v23 }
  0xe8   :  { %v648_v26 = vpop.f32.mrf.mxu0 }
  0xe9   :  { %666 = vmatmul.mubr.bf16.vlgmr.msra.gmra.mxu1 %v193_v25 }
  0xea   :  { %705 = vmatprep.mubr.msk.bf16.mxu1 %vm828_vm0, %v827_v0  ;;  %690 = vmatpush3.bf16.msra.mxu1 %v745_v29 }
  0xeb   :  { %691 = vmatprep.subr.bf16.mxu1 %v827_v0 }
  0xee   :  { %692 = vmatpush3.bf16.msra.mxu1 %v746_v30 }
  0xef   :  { %693 = vmatprep.subr.bf16.mxu1 %v827_v0 }
  0xf2   :  { %694 = vmatpush3.bf16.msra.mxu1 %v747_v31 }
  0xf3   :  { %695 = vmatprep.subr.bf16.mxu1 %v827_v0 }
  0xf6   :  { %696 = vmatpush3.bf16.msra.mxu1 %v748_v32 }
  0xf7   :  { %697 = vmatprep.subr.bf16.mxu1 %v827_v0 }
  0xfa   :  { %698 = vmatpush3.bf16.msra.mxu1 %v749_v33 }
  0xfb   :  { %699 = vmatprep.subr.bf16.mxu1 %v827_v0 }
  0xfe   :  { %700 = vmatpush3.bf16.msra.mxu1 %v750_v34 }
  0xff   :  { %701 = vmatprep.subr.bf16.mxu1 %v827_v0 }
 0x102   :  { %702 = vmatpush3.bf16.msra.mxu1 %v751_v43 }
 0x103   :  { %703 = vmatprep.subr.bf16.mxu1 %v827_v0 }
 0x106   :  { %704 = vmatpush3.bf16.msra.mxu1 %v752_v44 }
 0x1a9   :  { %v282_v36 = vpop.f32.mrf.mxu1 }
 0x1aa   :  { %v283_v37 = vadd.f32 %v576_v35, %v282_v36 }
 0x1ab   :  { %v667_v38 = vpop.f32.mrf.mxu1 }
 0x1ac   :  { %v288_v39 = vmax.f32 %v283_v37, 0.0 }
 0x1ad   :  { %v285_v40 = vpop.f32.mrf.mxu1 }
 0x1ae   :  { %v289_v41 = vpack.c.bf16 %v288_v39, %v288_v39 }
 0x1af   :  { %v668_v42 = vpop.f32.mrf.mxu1 }
 0x1b0   :  { %686 = vmatmul.mubr.bf16.vlgmr.msra.gmra.mxu0 %v289_v41 }
 0x1b1   :  { %717 = vmatprep.mubr.msk.bf16.mxu0 %vm828_vm0, %v827_v0  ;;  %710 = vmatpush3.bf16.msra.mxu0 %v753_v45 }
 0x1b2   :  { %711 = vmatprep.subr.bf16.mxu0 %v827_v0 }
 0x1b5   :  { %712 = vmatpush3.bf16.msra.mxu0 %v754_v46 }
 0x1b6   :  { %713 = vmatprep.subr.bf16.mxu0 %v827_v0 }
 0x1b9   :  { %714 = vmatpush3.bf16.msra.mxu0 %v755_v55 }
 0x1ba   :  { %715 = vmatprep.subr.bf16.mxu0 %v827_v0  ;;  %v603_v0 = vld [vmem:[%s1026_s10] ss:$0 sm:$0xff] }
 0x1bd   :  { %716 = vmatpush3.bf16.msra.mxu0 %v756_v56 }
 0x270   :  { %v378_v48 = vpop.f32.mrf.mxu0 }
 0x271   :  { %v379_v49 = vadd.f32 %v585_v47, %v378_v48 }
 0x272   :  { %v687_v50 = vpop.f32.mrf.mxu0 }
 0x273   :  { %v384_v51 = vmax.f32 %v379_v49, 0.0 }
 0x274   :  { %v381_v52 = vpop.f32.mrf.mxu0 }
 0x275   :  { %v385_v53 = vpack.c.bf16 %v384_v51, %v384_v51 }
 0x276   :  { %v688_v54 = vpop.f32.mrf.mxu0 }
 0x277   :  { %706 = vmatmul.mubr.bf16.vlgmr.msra.gmra.mxu1 %v385_v53 }
 0x337   :  { %v474_v58 = vpop.f32.mrf.mxu1 }
 0x338   :  { %v475_v59 = vadd.f32 %v594_v57, %v474_v58 }
 0x339   :  { %v707_v60 = vpop.f32.mrf.mxu1 }
 0x33a   :  { %v480_v61 = vmax.f32 %v475_v59, 0.0 }
 0x33b   :  { %v477_v62 = vpop.f32.mrf.mxu1 }
 0x33c   :  { %v481_v63 = vpack.c.bf16 %v480_v61, %v480_v61 }
 0x33d   :  { %v708_v1 = vpop.f32.mrf.mxu1 }
 0x33e   :  { %718 = vmatmul.mubr.msk.bf16.vlgmr.msra.gmra.mxu0 %vm512_vm3, %v481_v63 }
 0x3fe   :  { %v550_v2 = vpop.f32.mrf.mxu0 }
 0x3ff   :  { %v551_v3 = vadd.f32 %v603_v0, %v550_v2 }
 0x400   :  { %v719_v4 = vpop.f32.mrf.mxu0 }
 0x401   :  { %556 = vst [vmem:[#allocation7] sm:$0xf] %v551_v3 }
 0x402   :  { %v553_v5 = vpop.f32.mrf.mxu0 }
 0x403   :  { %808 = shalt.err (!%p805_p0)
}
 0x404   :  { %566 = dma.vmem_to_hbm [thread:$0]  %s564_s9, 64, %s1027_s11, [#allocation4]   ;;  %v720_v6 = vpop.f32.mrf.mxu0 }
 0x405   :  { %821 = dma.done.wait [#allocation4], 64  }
 0x406   :  { %822 = vsyncadd [#allocation4], 4294967232 }
 0x407   :  { %570 = vsyncpa [#allocation3], 1 }
 0x408   :  { %571 = vsyncpa [#allocation6], 1 }
 0x409   :  { %572 = vsyncpa [#allocation4], 1 }

</bundles_post_ra>
